<compile_context>
chip_gen: v5e
topology: v5e:2x2
jax: 0.10.0
libtpu: 0.0.40
codegen_flags: <defaults>
</compile_context>

<pallas_src>
import functools

import jax
import jax.numpy as jnp
from jax.experimental import pallas as pl
from jax.experimental.pallas import tpu as pltpu


def _round_up(x, m):
    return ((x + m - 1) // m) * m


def _cdiv(a, b):
    return -(-a // b)


def actor_kernel(x_ref, w1_ref, w2_ref, w3_ref, b_ref, out_ref, *, num_actions):
    tb, s = x_ref.shape
    h1_dim = w1_ref.shape[1]
    h2_dim = w2_ref.shape[1]
    out_pad = w3_ref.shape[1]          # lane-padded logits width (>= 128)

    # Packed biases: [b1 | b2 | b3(zero-padded)], all f32.
    b1 = b_ref[:, 0:h1_dim]
    b2 = b_ref[:, h1_dim:h1_dim + h2_dim]
    b3 = b_ref[:, h1_dim + h2_dim:h1_dim + h2_dim + out_pad]

    # ---- Layer 1 (K = state_size = 4): VPU broadcast-FMAs in f32. ----
    x = x_ref[...]
    w1 = w1_ref[...]
    h1 = b1 + x[:, 0:1] * w1[0:1, :]
    for k in range(1, s):
        h1 = h1 + x[:, k:k + 1] * w1[k:k + 1, :]
    h1 = jnp.maximum(h1, 0.0)

    # ---- Layer 2: MXU, bf16 inputs, f32 accumulation; bias/ReLU in f32. ----
    h2 = jnp.dot(h1.astype(jnp.bfloat16), w2_ref[...],
                 preferred_element_type=jnp.float32)
    h2 = jnp.maximum(h2 + b2, 0.0)

    # ---- Layer 3 (logits): f32 MXU matmul, lane-padded N for dense loads. ----
    logits = jnp.dot(h2, w3_ref[...], preferred_element_type=jnp.float32) + b3

    if num_actions == 2:
        # softmax over 2 logits == sigmoid(l0 - l1); stable form, VPU/EUP only.
        d = logits[:, 0:1] - logits[:, 1:2]
        e = jnp.exp(-jnp.abs(d))
        p_big = 1.0 / (1.0 + e)
        p0 = jnp.where(d >= 0, p_big, 1.0 - p_big)
        col = jax.lax.broadcasted_iota(jnp.int32, (tb, num_actions), 1)
        out_ref[...] = jnp.where(col == 0, p0, 1.0 - p0)   # narrow (tb, 2) store
    else:
        # Generic fallback: masked softmax over the first `num_actions` lanes.
        col = jax.lax.broadcasted_iota(jnp.int32, logits.shape, 1)
        valid = col < num_actions
        masked = jnp.where(valid, logits, -jnp.inf)
        m = jnp.max(masked, axis=-1, keepdims=True)
        e = jnp.where(valid, jnp.exp(masked - m), 0.0)
        denom = jnp.sum(e, axis=-1, keepdims=True)
        probs = e * pl.reciprocal(denom, approx=True)       # EUP divide
        out_ref[...] = probs[:, :num_actions]               # narrow store


def pack_params(params, *, out_pad=128):
    """Pre-pack parameters once: bf16 weights for the big MXU matmul, layer-3
    weights/bias lane-padded to 128 and kept in f32 (accurate logits), and all
    three biases concatenated into a single slab (one DMA)."""
    w1, b1, w2, b2, w3, b3 = params
    num_actions = w3.shape[1]
    out_pad = max(out_pad, _round_up(num_actions, 128))
    w3p = jnp.zeros((w3.shape[0], out_pad), jnp.float32).at[:, :num_actions].set(w3)
    b3p = jnp.zeros((1, out_pad), jnp.float32).at[:, :num_actions].set(b3)
    bias_pack = jnp.concatenate(
        [b1.astype(jnp.float32), b2.astype(jnp.float32), b3p], axis=1)
    return dict(
        w1=w1.astype(jnp.float32),          # layer 1 runs on the VPU in f32
        w2=w2.astype(jnp.bfloat16),
        w3=w3p,                             # f32: accurate logits, still cheap
        bias=bias_pack,
        num_actions=num_actions,
    )


def actor_forward(state, packed, *, block_b=2048, vmem_limit_bytes=None):
    """Returns the Categorical probabilities (the distribution's parameters).

    # TODO(synk): torch.distributions.Categorical itself (sampling/log_prob) has
    # no Pallas equivalent; we return its softmax probabilities, which fully
    # define the distribution.
    """
    w1, w2, w3, bias = packed["w1"], packed["w2"], packed["w3"], packed["bias"]
    num_actions = packed["num_actions"]
    b, s = state.shape
    h1_dim, h2_dim, out_pad = w1.shape[1], w2.shape[1], w3.shape[1]

    # Tile sizing:
    #  * up to 2048 rows per tile (amortizes per-grid-step overhead; ~4.5 MiB of
    #    VMEM intermediates at tb=2048, safe on v5e/v6e/v7x default limits).
    #  * force >= 2 grid steps whenever the batch is more than one sublane row,
    #    so the "parallel" axis shards across both v7x TensorCores.
    block_b = max(8, min(block_b, 2048))
    b_pad8 = _round_up(b, 8)
    n_tiles = _cdiv(b_pad8, block_b)
    if b_pad8 > 8:
        n_tiles = max(n_tiles, 2)
    tb = _round_up(_cdiv(b_pad8, n_tiles), 8)
    b_pad = _round_up(b_pad8, tb)

    x = state.astype(jnp.float32)
    if b_pad != b:
        x = jnp.pad(x, ((0, b_pad - b), (0, 0)))

    kernel = functools.partial(actor_kernel, num_actions=num_actions)
    out = pl.pallas_call(
        kernel,
        out_shape=jax.ShapeDtypeStruct((b_pad, num_actions), jnp.float32),
        grid=(b_pad // tb,),
        in_specs=[
            pl.BlockSpec((tb, s), lambda i: (i, 0)),              # state tile
            pl.BlockSpec((s, h1_dim), lambda i: (0, 0)),          # w1 (resident)
            pl.BlockSpec((h1_dim, h2_dim), lambda i: (0, 0)),     # w2 (resident)
            pl.BlockSpec((h2_dim, out_pad), lambda i: (0, 0)),    # w3 (resident)
            pl.BlockSpec((1, h1_dim + h2_dim + out_pad), lambda i: (0, 0)),
        ],
        out_specs=pl.BlockSpec((tb, num_actions), lambda i: (i, 0)),  # narrow out
        compiler_params=pltpu.CompilerParams(
            dimension_semantics=("parallel",),    # shard batch tiles across TCs
            vmem_limit_bytes=vmem_limit_bytes),
    )(x, w1, w2, w3, bias)
    return out[:b]


def init_params(key, state_size, action_size):
    """Deterministic init mimicking torch.nn.Linear (uniform +-1/sqrt(fan_in)).

    Weights are stored as [in, out] (transposed vs PyTorch) so the kernel can
    use them directly in x @ W.
    """
    dims = [(state_size, 128), (128, 256), (256, action_size)]
    params = []
    for (fan_in, fan_out) in dims:
        key, kw, kb = jax.random.split(key, 3)
        bound = 1.0 / jnp.sqrt(fan_in)
        w = jax.random.uniform(kw, (fan_in, fan_out), jnp.float32, -bound, bound)
        b = jax.random.uniform(kb, (1, fan_out), jnp.float32, -bound, bound)
        params += [w, b]
    return tuple(params)


if __name__ == "__main__":
    state_size = 4     # CartPole-v1 observation dim
    action_size = 2    # CartPole-v1 action dim

    key = jax.random.PRNGKey(0)
    params = init_params(key, state_size, action_size)
    packed = pack_params(params)

    w1, b1, w2, b2, w3, b3 = params

    def ref_forward(x):
        h1 = jnp.maximum(x @ w1 + b1, 0.0)
        h2 = jnp.maximum(h1 @ w2 + b2, 0.0)
        return jax.nn.softmax(h2 @ w3 + b3, axis=-1)

    # Exercise both a single-tile grid (batch=8) and a multi-tile, padded grid
    # (batch=40 -> 2 tiles on v7x-style sharding).
    for batch in (8, 40):
        key, kx = jax.random.split(key)
        state = jax.random.normal(kx, (batch, state_size), dtype=jnp.float32)

        probs = jax.block_until_ready(actor_forward(state, packed))

        # Sanity: valid categorical distribution per row.
        assert probs.shape == (batch, action_size)
        assert bool(jnp.all(probs >= 0.0))
        assert bool(jnp.allclose(jnp.sum(probs, axis=-1), 1.0, atol=1e-5))

        # Cross-check against a plain-JAX f32 reference of the same forward pass
        # (loose tolerance because layer 2 uses bf16 MXU inputs).
        assert bool(jnp.allclose(probs, ref_forward(state), atol=3e-2))

    print("KERNEL_OK")
</pallas_src>

<mosaic_0001>
module attributes {stable_mosaic.version = 11 : i64} {
  func.func @actor_kernel(%arg0: i32, %arg1: memref<8x4xf32, #tpu.memory_space<vmem>>, %arg2: memref<4x128xf32, #tpu.memory_space<vmem>>, %arg3: memref<128x256xbf16, #tpu.memory_space<vmem>>, %arg4: memref<256x128xf32, #tpu.memory_space<vmem>>, %arg5: memref<1x512xf32, #tpu.memory_space<vmem>>, %arg6: memref<8x2xf32, #tpu.memory_space<vmem>>) attributes {dimension_semantics = [#tpu.dimension_semantics<parallel>], iteration_bounds = array<i64: 1>, scalar_prefetch = 0 : i64, scratch_operands = 0 : i64, tpu.core_type = #tpu.core_type<tc>, window_params = [{transform_indices = @transform_0, window_bounds = array<i64: 8, 4>}, {pipeline_mode = #tpu.pipeline_mode<synchronous>, transform_indices = @transform_1, window_bounds = array<i64: 4, 128>}, {pipeline_mode = #tpu.pipeline_mode<synchronous>, transform_indices = @transform_2, window_bounds = array<i64: 128, 256>}, {pipeline_mode = #tpu.pipeline_mode<synchronous>, transform_indices = @transform_3, window_bounds = array<i64: 256, 128>}, {pipeline_mode = #tpu.pipeline_mode<synchronous>, transform_indices = @transform_4, window_bounds = array<i64: 1, 512>}, {transform_indices = @transform_5, window_bounds = array<i64: 8, 2>}]} {
    %c0 = arith.constant 0 : index
    %c0_0 = arith.constant 0 : index
    %0 = vector.load %arg5[%c0, %c0_0] : memref<1x512xf32, #tpu.memory_space<vmem>>, vector<1x128xf32>
    %c0_1 = arith.constant 0 : index
    %c128 = arith.constant 128 : index
    %1 = vector.load %arg5[%c0_1, %c128] : memref<1x512xf32, #tpu.memory_space<vmem>>, vector<1x256xf32>
    %c0_2 = arith.constant 0 : index
    %c384 = arith.constant 384 : index
    %2 = vector.load %arg5[%c0_2, %c384] : memref<1x512xf32, #tpu.memory_space<vmem>>, vector<1x128xf32>
    %c0_3 = arith.constant 0 : index
    %c0_4 = arith.constant 0 : index
    %3 = vector.load %arg1[%c0_3, %c0_4] : memref<8x4xf32, #tpu.memory_space<vmem>>, vector<8x4xf32>
    %c0_5 = arith.constant 0 : index
    %c0_6 = arith.constant 0 : index
    %4 = vector.load %arg2[%c0_5, %c0_6] : memref<4x128xf32, #tpu.memory_space<vmem>>, vector<4x128xf32>
    %5 = vector.extract_strided_slice %3 {offsets = [0, 0], sizes = [8, 1], strides = [1, 1]} : vector<8x4xf32> to vector<8x1xf32>
    %6 = vector.extract_strided_slice %4 {offsets = [0, 0], sizes = [1, 128], strides = [1, 1]} : vector<4x128xf32> to vector<1x128xf32>
    %7 = vector.broadcast %5 : vector<8x1xf32> to vector<8x128xf32>
    %8 = vector.broadcast %6 : vector<1x128xf32> to vector<8x128xf32>
    %9 = arith.mulf %7, %8 : vector<8x128xf32>
    %10 = vector.broadcast %0 : vector<1x128xf32> to vector<8x128xf32>
    %11 = arith.addf %10, %9 : vector<8x128xf32>
    %12 = vector.extract_strided_slice %3 {offsets = [0, 1], sizes = [8, 1], strides = [1, 1]} : vector<8x4xf32> to vector<8x1xf32>
    %13 = vector.extract_strided_slice %4 {offsets = [1, 0], sizes = [1, 128], strides = [1, 1]} : vector<4x128xf32> to vector<1x128xf32>
    %14 = vector.broadcast %12 : vector<8x1xf32> to vector<8x128xf32>
    %15 = vector.broadcast %13 : vector<1x128xf32> to vector<8x128xf32>
    %16 = arith.mulf %14, %15 : vector<8x128xf32>
    %17 = arith.addf %11, %16 : vector<8x128xf32>
    %18 = vector.extract_strided_slice %3 {offsets = [0, 2], sizes = [8, 1], strides = [1, 1]} : vector<8x4xf32> to vector<8x1xf32>
    %19 = vector.extract_strided_slice %4 {offsets = [2, 0], sizes = [1, 128], strides = [1, 1]} : vector<4x128xf32> to vector<1x128xf32>
    %20 = vector.broadcast %18 : vector<8x1xf32> to vector<8x128xf32>
    %21 = vector.broadcast %19 : vector<1x128xf32> to vector<8x128xf32>
    %22 = arith.mulf %20, %21 : vector<8x128xf32>
    %23 = arith.addf %17, %22 : vector<8x128xf32>
    %24 = vector.extract_strided_slice %3 {offsets = [0, 3], sizes = [8, 1], strides = [1, 1]} : vector<8x4xf32> to vector<8x1xf32>
    %25 = vector.extract_strided_slice %4 {offsets = [3, 0], sizes = [1, 128], strides = [1, 1]} : vector<4x128xf32> to vector<1x128xf32>
    %26 = vector.broadcast %24 : vector<8x1xf32> to vector<8x128xf32>
    %27 = vector.broadcast %25 : vector<1x128xf32> to vector<8x128xf32>
    %28 = arith.mulf %26, %27 : vector<8x128xf32>
    %29 = arith.addf %23, %28 : vector<8x128xf32>
    %cst = arith.constant 0.000000e+00 : f32
    %30 = vector.broadcast %cst : f32 to vector<8x128xf32>
    %31 = arith.maximumf %29, %30 : vector<8x128xf32>
    %32 = arith.truncf %31 : vector<8x128xf32> to vector<8x128xbf16>
    %c0_7 = arith.constant 0 : index
    %c0_8 = arith.constant 0 : index
    %33 = vector.load %arg3[%c0_7, %c0_8] : memref<128x256xbf16, #tpu.memory_space<vmem>>, vector<128x256xbf16>
    %cst_9 = arith.constant dense<0.000000e+00> : vector<8x256xf32>
    %34 = tpu.matmul %32, %33, %cst_9 {dimension_numbers = #tpu.dot_dimension_numbers<[1], [0], [0], [1], [0, 0, 1, 1], [], []>} : vector<8x128xbf16>, vector<128x256xbf16>, vector<8x256xf32> -> vector<8x256xf32>
    %35 = vector.broadcast %1 : vector<1x256xf32> to vector<8x256xf32>
    %36 = arith.addf %34, %35 : vector<8x256xf32>
    %cst_10 = arith.constant 0.000000e+00 : f32
    %37 = vector.broadcast %cst_10 : f32 to vector<8x256xf32>
    %38 = arith.maximumf %36, %37 : vector<8x256xf32>
    %c0_11 = arith.constant 0 : index
    %c0_12 = arith.constant 0 : index
    %39 = vector.load %arg4[%c0_11, %c0_12] : memref<256x128xf32, #tpu.memory_space<vmem>>, vector<256x128xf32>
    %cst_13 = arith.constant dense<0.000000e+00> : vector<8x128xf32>
    %40 = tpu.matmul %38, %39, %cst_13 {dimension_numbers = #tpu.dot_dimension_numbers<[1], [0], [0], [1], [0, 0, 1, 1], [], []>} : vector<8x256xf32>, vector<256x128xf32>, vector<8x128xf32> -> vector<8x128xf32>
    %41 = vector.broadcast %2 : vector<1x128xf32> to vector<8x128xf32>
    %42 = arith.addf %40, %41 : vector<8x128xf32>
    %43 = vector.extract_strided_slice %42 {offsets = [0, 0], sizes = [8, 1], strides = [1, 1]} : vector<8x128xf32> to vector<8x1xf32>
    %44 = vector.extract_strided_slice %42 {offsets = [0, 1], sizes = [8, 1], strides = [1, 1]} : vector<8x128xf32> to vector<8x1xf32>
    %45 = arith.subf %43, %44 : vector<8x1xf32>
    %46 = math.absf %45 : vector<8x1xf32>
    %cst_14 = arith.constant 0.000000e+00 : f32
    %47 = vector.broadcast %cst_14 : f32 to vector<8x1xf32>
    %48 = arith.subf %47, %46 : vector<8x1xf32>
    %49 = math.exp %48 : vector<8x1xf32>
    %cst_15 = arith.constant 1.000000e+00 : f32
    %50 = vector.broadcast %cst_15 : f32 to vector<8x1xf32>
    %51 = arith.addf %50, %49 : vector<8x1xf32>
    %cst_16 = arith.constant 1.000000e+00 : f32
    %52 = vector.broadcast %cst_16 : f32 to vector<8x1xf32>
    %53 = arith.divf %52, %51 : vector<8x1xf32>
    %cst_17 = arith.constant 0.000000e+00 : f32
    %54 = vector.broadcast %cst_17 : f32 to vector<8x1xf32>
    %55 = arith.cmpf oge, %45, %54 : vector<8x1xf32>
    %cst_18 = arith.constant 1.000000e+00 : f32
    %56 = vector.broadcast %cst_18 : f32 to vector<8x1xf32>
    %57 = arith.subf %56, %53 : vector<8x1xf32>
    %58 = arith.select %55, %53, %57 : vector<8x1xi1>, vector<8x1xf32>
    %59 = tpu.iota {dimensions = array<i32: 1>} : vector<8x2xi32>
    %c0_i32 = arith.constant 0 : i32
    %60 = vector.broadcast %c0_i32 : i32 to vector<8x2xi32>
    %61 = arith.cmpi eq, %59, %60 : vector<8x2xi32>
    %cst_19 = arith.constant 1.000000e+00 : f32
    %62 = vector.broadcast %cst_19 : f32 to vector<8x1xf32>
    %63 = arith.subf %62, %58 : vector<8x1xf32>
    %64 = vector.shape_cast %58 : vector<8x1xf32> to vector<8x1xf32>
    %65 = vector.broadcast %64 : vector<8x1xf32> to vector<8x2xf32>
    %66 = vector.shape_cast %63 : vector<8x1xf32> to vector<8x1xf32>
    %67 = vector.broadcast %66 : vector<8x1xf32> to vector<8x2xf32>
    %68 = arith.select %61, %65, %67 : vector<8x2xi1>, vector<8x2xf32>
    %c0_20 = arith.constant 0 : index
    %c0_21 = arith.constant 0 : index
    %69 = vector.load %arg6[%c0_20, %c0_21] : memref<8x2xf32, #tpu.memory_space<vmem>>, vector<8x2xf32>
    tpu.vector_store %arg6[%c0_20, %c0_21], %68 {strides = array<i32>} : memref<8x2xf32, #tpu.memory_space<vmem>>, vector<8x2xf32>,
    return
  }
  func.func @transform_0(%arg0: i32) -> (i32, i32) {
    %c0_i32 = arith.constant 0 : i32
    %c0_i32_0 = arith.constant 0 : i32
    return %arg0, %c0_i32 : i32, i32
  }
  func.func @transform_1(%arg0: i32) -> (i32, i32) {
    %c0_i32 = arith.constant 0 : i32
    %c0_i32_0 = arith.constant 0 : i32
    %c0_i32_1 = arith.constant 0 : i32
    return %c0_i32, %c0_i32_0 : i32, i32
  }
  func.func @transform_2(%arg0: i32) -> (i32, i32) {
    %c0_i32 = arith.constant 0 : i32
    %c0_i32_0 = arith.constant 0 : i32
    %c0_i32_1 = arith.constant 0 : i32
    return %c0_i32, %c0_i32_0 : i32, i32
  }
  func.func @transform_3(%arg0: i32) -> (i32, i32) {
    %c0_i32 = arith.constant 0 : i32
    %c0_i32_0 = arith.constant 0 : i32
    %c0_i32_1 = arith.constant 0 : i32
    return %c0_i32, %c0_i32_0 : i32, i32
  }
  func.func @transform_4(%arg0: i32) -> (i32, i32) {
    %c0_i32 = arith.constant 0 : i32
    %c0_i32_0 = arith.constant 0 : i32
    %c0_i32_1 = arith.constant 0 : i32
    return %c0_i32, %c0_i32_0 : i32, i32
  }
  func.func @transform_5(%arg0: i32) -> (i32, i32) {
    %c0_i32 = arith.constant 0 : i32
    %c0_i32_0 = arith.constant 0 : i32
    return %arg0, %c0_i32 : i32, i32
  }
}

</mosaic_0001>

<bundles_post_ra>
// kernel: tpu_custom_call.1
= control target key start
LH: loop header
LB: loop body
LE: loop exit
PB: predicated region body
PF: predicated region fallthrough
CT: control target
= control target key end

     0   :  { %10 = vsyncpa [#allocation3], 0  ;;  %s563_s0 = inlined_call_operand.vmem [shape: f32[8,4], index: 0, kind: input, shape index: {}]   ;;  %s564_s1 = inlined_call_operand.vmem [shape: f32[4,128], index: 1, kind: input, shape index: {}]   ;;  %s565_s2 = inlined_call_operand.hbm [shape: bf16[128,256], index: 2, kind: input, shape index: {}]   ;;  %s566_s3 = inlined_call_operand.hbm [shape: f32[256,128], index: 3, kind: input, shape index: {}]   ;;  %s567_s4 = inlined_call_operand.vmem [shape: f32[1,512], index: 4, kind: input, shape index: {}]   ;;  %s568_s5 = inlined_call_operand.vmem [shape: f32[8,2], index: 5, kind: output, shape index: {}]  }
   0x1   :  { %s20_s20 = sshll.u32 %s565_s2, 4  ;;  %s21_s20 = int_to_ptr.hbm [resolvable:$true] %s20_s20 }
   0x2   :  { %11 = vsyncpa [#allocation5], 0  ;;  %s500_s21 = smov [#allocation2]   ;;  %s33_s25 = sshll.u32 %s566_s3, 4  ;;  %s34_s25 = int_to_ptr.hbm [resolvable:$true] %s33_s25 }
   0x3   :  { %s22_s22 = sshll.u32 %s500_s21, 4  ;;  %s501_s26 = smov 128   ;;  %s23_s22 = int_to_ptr.vmem [resolvable:$true] %s22_s22 }
   0x4   :  { %s502_s27 = smov 8   ;;  %s503_s28 = smov [#allocation4]  }
   0x5   :  { %28 = dma.hbm_to_vmem [thread:$0]  %s21_s20, 2048, %s23_s22, [#allocation3], %s501_s26, %s501_s26, %s502_s27  }
   0x6   :  { %s35_s29 = sshll.u32 %s503_s28, 4  ;;  %s36_s29 = int_to_ptr.vmem [resolvable:$true] %s35_s29 }
   0x7   :  { %41 = dma.hbm_to_vmem [thread:$0]  %s34_s25, 4096, %s36_s29, [#allocation5], %s501_s26, %s501_s26, %s502_s27  }
   0x8   :  { %496 = dma.done.wait [#allocation3], 2048  }
   0x9   :  { %497 = vsyncadd [#allocation3], 4294965248 }
   0xa   :  { %498 = dma.done.wait [#allocation5], 4096  }
   0xb   :  { %499 = vsyncadd [#allocation5], 4294963200  ;;  %v504_v0 = vmov 0   ;;  %v505_v1 = vmov 2   ;;  %v55_v2 = vld [vmem:[%s563_s0] sm:$0xff]  ;;  %v506_v21 = vmov 1  }
   0xc   :  { %435 = vset.pattern.permute.xlu0 %v504_v0  ;;  %437 = vset.pattern.permute.xlu1 %v505_v1  ;;  %v404_v3 = vld [vmem:[#allocation2 + $0x70] sm:$0xf]  ;;  %v425_v4 = vld [vmem:[#allocation2 + $0x74] sm:$0xf0]  ;;  %v424_v6 = vld [vmem:[#allocation2 + $0x74] sm:$0xf] }
   0xd   :  { %439 = vset.pattern.permute.xlu2 %v504_v0  ;;  %59 = vperm.xlu0 %435, %v55_v2   ;;  %v405_v5 = vor.u32 %v425_v4, %v404_v3  ;;  %v406_v7 = vld [vmem:[#allocation2 + $0x78] sm:$0xf0]  ;;  %v396_v8 = vld [vmem:[#allocation2 + $0x60] sm:$0xf]  ;;  %v423_v10 = vld [vmem:[#allocation2 + $0x64] sm:$0xf0] }
   0xe   :  { %76 = vperm.xlu1 %437, %v55_v2   ;;  %v409_v9 = vor.u32 %v424_v6, %v406_v7  ;;  %v422_v11 = vld [vmem:[#allocation2 + $0x64] sm:$0xf]  ;;  %v398_v12 = vld [vmem:[#allocation2 + $0x68] sm:$0xf0]  ;;  %v397_v13 = vor.u32 %v423_v10, %v396_v8  ;;  %v388_v15 = vld [vmem:[#allocation2 + $0x50] sm:$0xf] }
   0xf   :  { %192 = vmatpush.bf16.msra.mxu0 %v405_v5  ;;  %v401_v14 = vor.u32 %v422_v11, %v398_v12  ;;  %v421_v16 = vld [vmem:[#allocation2 + $0x54] sm:$0xf0]  ;;  %v420_v17 = vld [vmem:[#allocation2 + $0x54] sm:$0xf]  ;;  %v390_v18 = vld [vmem:[#allocation2 + $0x58] sm:$0xf0] }
  0x10   :  { %205 = vmatpush.bf16.msra.mxu1 %v409_v9  ;;  %v389_v19 = vor.u32 %v421_v16, %v388_v15  ;;  %v393_v20 = vor.u32 %v420_v17, %v390_v18  ;;  %v507_v22 = vmov 3   ;;  %v380_v23 = vld [vmem:[#allocation2 + $0x40] sm:$0xf]  ;;  %v419_v24 = vld [vmem:[#allocation2 + $0x44] sm:$0xf0]  ;;  %v235_v53 = vld [vmem:[#allocation4 + $0x78] sm:$0xff] }
  0x11   :  { %v418_v25 = vld [vmem:[#allocation2 + $0x44] sm:$0xf]  ;;  %v381_v26 = vor.u32 %v419_v24, %v380_v23  ;;  %v382_v27 = vld [vmem:[#allocation2 + $0x48] sm:$0xf0]  ;;  %v372_v29 = vld [vmem:[#allocation2 + $0x30] sm:$0xf]  ;;  %255 = vmatpush.msra.mxu2 %v235_v53 }
  0x12   :  { %v385_v28 = vor.u32 %v418_v25, %v382_v27  ;;  %v417_v30 = vld [vmem:[#allocation2 + $0x34] sm:$0xf0]  ;;  %v416_v32 = vld [vmem:[#allocation2 + $0x34] sm:$0xf]  ;;  %v374_v33 = vld [vmem:[#allocation2 + $0x38] sm:$0xf0] }
  0x13   :  { %193 = vmatpush.bf16.msra.mxu0 %v397_v13  ;;  %v373_v31 = vor.u32 %v417_v30, %v372_v29  ;;  %v377_v34 = vor.u32 %v416_v32, %v374_v33  ;;  %v364_v35 = vld [vmem:[#allocation2 + $0x20] sm:$0xf]  ;;  %v415_v36 = vld [vmem:[#allocation2 + $0x24] sm:$0xf0]  ;;  %v414_v37 = vld [vmem:[#allocation2 + $0x24] sm:$0xf] }
  0x14   :  { %206 = vmatpush.bf16.msra.mxu1 %v401_v14  ;;  %v365_v38 = vor.u32 %v415_v36, %v364_v35  ;;  %v366_v39 = vld [vmem:[#allocation2 + $0x28] sm:$0xf0]  ;;  %v356_v41 = vld [vmem:[#allocation2 + $0x10] sm:$0xf]  ;;  %v413_v42 = vld [vmem:[#allocation2 + $0x14] sm:$0xf0] }
  0x15   :  { %436 = vset.pattern.permute.xlu0 %v506_v21  ;;  %v369_v40 = vor.u32 %v414_v37, %v366_v39  ;;  %v357_v43 = vor.u32 %v413_v42, %v356_v41  ;;  %v412_v44 = vld [vmem:[#allocation2 + $0x14] sm:$0xf]  ;;  %v358_v45 = vld [vmem:[#allocation2 + $0x18] sm:$0xf0]  ;;  %v348_v46 = vld [vmem:[#allocation2] sm:$0xf] }
  0x16   :  { %438 = vset.pattern.permute.xlu1 %v507_v22  ;;  %69 = vperm.xlu0 %436, %v55_v2   ;;  %v361_v47 = vor.u32 %v412_v44, %v358_v45  ;;  %v411_v48 = vld [vmem:[#allocation2 + $0x4] sm:$0xf0]  ;;  %v410_v49 = vld [vmem:[#allocation2 + $0x4] sm:$0xf]  ;;  %v350_v50 = vld [vmem:[#allocation2 + $0x8] sm:$0xf0] }
  0x17   :  { %83 = vperm.xlu1 %438, %v55_v2   ;;  %194 = vmatpush.bf16.msra.mxu0 %v389_v19  ;;  %v349_v51 = vor.u32 %v411_v48, %v348_v46  ;;  %v353_v52 = vor.u32 %v410_v49, %v350_v50  ;;  %v251_v54 = vld [vmem:[#allocation4 + $0xf8] sm:$0xff]  ;;  %v234_v55 = vld [vmem:[#allocation4 + $0x70] sm:$0xff]  ;;  %v233_v57 = vld [vmem:[#allocation4 + $0x68] sm:$0xff]  ;;  %s508_s11 = smov 127   ;;  %vm338_vm6 = vcmask 15360  }
  0x18   :  { %207 = vmatpush.bf16.msra.mxu1 %v393_v20  ;;  %275 = vmatpush.msra.mxu3 %v251_v54  ;;  %v250_v56 = vld [vmem:[#allocation4 + $0xf0] sm:$0xff]  ;;  %v249_v58 = vld [vmem:[#allocation4 + $0xe8] sm:$0xff]  ;;  %v232_v59 = vld [vmem:[#allocation4 + $0x60] sm:$0xff] }
  0x19   :  { %256 = vmatpush.msra.mxu2 %v234_v55  ;;  %v248_v60 = vld [vmem:[#allocation4 + $0xe0] sm:$0xff]  ;;  %v231_v61 = vld [vmem:[#allocation4 + $0x58] sm:$0xff]  ;;  %v230_v63 = vld [vmem:[#allocation4 + $0x50] sm:$0xff] }
  0x1a   :  { %276 = vmatpush.msra.mxu3 %v250_v56  ;;  %v247_v62 = vld [vmem:[#allocation4 + $0xd8] sm:$0xff]  ;;  %v56_v1 = vld [vmem:[%s564_s1] sm:$0xf]  ;;  %v229_v4 = vld [vmem:[#allocation4 + $0x48] sm:$0xff] }
  0x1b   :  { %195 = vmatpush.bf16.msra.mxu0 %v381_v26  ;;  %257 = vmatpush.msra.mxu2 %v233_v57  ;;  %v245_v5 = vld [vmem:[#allocation4 + $0xc8] sm:$0xff]  ;;  %v62_v6 = vperm.slane %v56_v1, 0  ;;  %v228_v7 = vld [vmem:[#allocation4 + $0x40] sm:$0xff]  ;;  %v227_v9 = vld [vmem:[#allocation4 + $0x38] sm:$0xff]  ;;  %v72_v13 = vperm.slane %v56_v1, 1  ;;  %v79_v16 = vperm.slane %v56_v1, 2 }
  0x1c   :  { %208 = vmatpush.bf16.msra.mxu1 %v385_v28  ;;  %277 = vmatpush.msra.mxu3 %v249_v58  ;;  %v244_v8 = vld [vmem:[#allocation4 + $0xc0] sm:$0xff]  ;;  %v243_v10 = vld [vmem:[#allocation4 + $0xb8] sm:$0xff]  ;;  %v226_v14 = vld [vmem:[#allocation4 + $0x30] sm:$0xff]  ;;  %v86_v17 = vperm.slane %v56_v1, 3 }
  0x1d   :  { %258 = vmatpush.msra.mxu2 %v232_v59  ;;  %v442_v12 = vld [vmem:[%s567_s4] ss:$0 sm:$0xff]  ;;  %v242_v15 = vld [vmem:[#allocation4 + $0xb0] sm:$0xff]  ;;  %v225_v18 = vld [vmem:[#allocation4 + $0x28] sm:$0xff] }
  0x1e   :  { %441 = vset.pattern.permute.xlu0 %v504_v0  ;;  %278 = vmatpush.msra.mxu3 %v248_v60  ;;  %v241_v19 = vld [vmem:[#allocation4 + $0xa8] sm:$0xff]  ;;  %v224_v24 = vld [vmem:[#allocation4 + $0x20] sm:$0xff]  ;;  %v223_v29 = vld [vmem:[#allocation4 + $0x18] sm:$0xff] }
  0x1f   :  { %440 = vset.pattern.permute.xlu1 %v504_v0  ;;  %196 = vmatpush.bf16.msra.mxu0 %v373_v31  ;;  %v246_v0 = vld [vmem:[#allocation4 + $0xd0] sm:$0xff]  ;;  %v240_v25 = vld [vmem:[#allocation4 + $0xa0] sm:$0xff]  ;;  %v239_v30 = vld [vmem:[#allocation4 + $0x98] sm:$0xff] }
  0x20   :  { %209 = vmatpush.bf16.msra.mxu1 %v377_v34  ;;  %259 = vmatpush.msra.mxu2 %v231_v61  ;;  %v222_v35 = vld [vmem:[#allocation4 + $0x10] sm:$0xff]  ;;  %v221_v37 = vld [vmem:[#allocation4 + $0x8] sm:$0xff]  ;;  %v220_v39 = vld [vmem:[#allocation4] sm:$0xff] }
  0x21   :  { %279 = vmatpush.msra.mxu3 %v247_v62  ;;  %v238_v36 = vld [vmem:[#allocation4 + $0x90] sm:$0xff]  ;;  %v53_v41 = vld [vmem:[%s567_s4 + $0x1] sm:$0x3] }
  0x22   :  { %260 = vmatpush.msra.mxu2 %v230_v63  ;;  %v108_v42 = vperm.slane %v53_v41, 0 }
  0x23   :  { %197 = vmatpush.bf16.msra.mxu0 %v365_v38  ;;  %280 = vmatpush.msra.mxu3 %v246_v0  ;;  %v237_v38 = vld [vmem:[#allocation4 + $0x88] sm:$0xff] }
  0x24   :  { %210 = vmatpush.bf16.msra.mxu1 %v369_v40  ;;  %261 = vmatpush.msra.mxu2 %v229_v4  ;;  %v236_v40 = vld [vmem:[#allocation4 + $0x80] sm:$0xff] }
  0x25   :  { %281 = vmatpush.msra.mxu3 %v245_v5 }
  0x26   :  { %262 = vmatpush.msra.mxu2 %v228_v7 }
  0x27   :  { %198 = vmatpush.bf16.msra.mxu0 %v357_v43  ;;  %282 = vmatpush.msra.mxu3 %v244_v8  ;;  %v109_v43 = vperm.slane %v53_v41, 1 }
  0x28   :  { %211 = vmatpush.bf16.msra.mxu1 %v361_v47  ;;  %263 = vmatpush.msra.mxu2 %v227_v9 }
  0x29   :  { %283 = vmatpush.msra.mxu3 %v243_v10 }
  0x2a   :  { %264 = vmatpush.msra.mxu2 %v226_v14 }
  0x2b   :  { %199 = vmatpush.bf16.msra.mxu0 %v349_v51  ;;  %284 = vmatpush.msra.mxu3 %v242_v15 }
  0x2c   :  { %212 = vmatpush.bf16.msra.mxu1 %v353_v52  ;;  %265 = vmatpush.msra.mxu2 %v225_v18  ;;  %v443_v52 = vld [vmem:[%s567_s4 + $0x3] ss:$0 sm:$0xff] }
  0x2d   :  { %285 = vmatpush.msra.mxu3 %v241_v19 }
  0x2e   :  { %266 = vmatpush.msra.mxu2 %v224_v24 }
  0x2f   :  { %286 = vmatpush.msra.mxu3 %v240_v25 }
  0x30   :  { %267 = vmatpush.msra.mxu2 %v223_v29 }
  0x31   :  { %287 = vmatpush.msra.mxu3 %v239_v30 }
  0x32   :  { %268 = vmatpush.msra.mxu2 %v222_v35 }
  0x33   :  { %288 = vmatpush.msra.mxu3 %v238_v36 }
  0x34   :  { %269 = vmatpush.msra.mxu2 %v221_v37 }
  0x35   :  { %289 = vmatpush.msra.mxu3 %v237_v38 }
  0x36   :  { %270 = vmatpush.msra.mxu2 %v220_v39 }
  0x37   :  { %290 = vmatpush.msra.mxu3 %v236_v40 }
  0x7f   :  { %v60_v2 = vpop.permute.xlu0 %59 }
  0x80   :  { %v77_v3 = vpop.permute.xlu1 %76  ;;  %v63_v11 = vmul.f32 %v62_v6, %v60_v2 }
  0x81   :  { %v80_v26 = vmul.f32 %v79_v16, %v77_v3 }
  0x82   :  { %v67_v22 = vadd.f32 %v442_v12, %v63_v11 }
  0x88   :  { %v70_v20 = vpop.permute.xlu0 %69 }
  0x89   :  { %v84_v21 = vpop.permute.xlu1 %83  ;;  %v73_v23 = vmul.f32 %v72_v13, %v70_v20  ;;  %v323_v13 = vlaneseq }
  0x8a   :  { %v87_v28 = vmul.f32 %v86_v17, %v84_v21 }
  0x8b   :  { %v74_v27 = vadd.f32 %v73_v23, %v67_v22  ;;  %v324_v14 = vand.u32 127, %v323_v13 }
  0x8d   :  { %v81_v31 = vadd.f32 %v80_v26, %v74_v27  ;;  %vm325_vm5 = vcmp.eq.s32.totalorder %v324_v14, 0 }
  0x8f   :  { %v88_v32 = vadd.f32 %v87_v28, %v81_v31 }
  0x91   :  { %v89_v33 = vmax.f32 %v88_v32, 0.0 }
  0x93   :  { %v90_v34 = vpack.c.bf16 %v89_v33, %v89_v33 }
  0x95   :  { %200 = vmatmul.bf16.vlgmr.msra.gmra.mxu0 %v90_v34  ;;  %213 = vmatmul.bf16.vlgmr.msra.gmra.mxu1 %v90_v34 }
 0x112   :  { %v201_v44 = vpop.f32.mrf.mxu0  ;;  %v214_v45 = vpop.f32.mrf.mxu1 }
 0x113   :  { %v202_v46 = vadd.f32 %v201_v44, %v108_v42  ;;  %v215_v47 = vadd.f32 %v214_v45, %v109_v43 }
 0x115   :  { %v218_v48 = vmax.f32 %v202_v46, 0.0  ;;  %v219_v49 = vmax.f32 %v215_v47, 0.0 }
 0x117   :  { %271 = vmatmul.f32.vlgmr.msra.gmra.mxu2 %v218_v48  ;;  %291 = vmatmul.f32.vlgmr.msra.gmra.mxu3 %v219_v49 }
 0x11a   :  { %v203_v50 = vpop.f32.mrf.mxu0  ;;  %v216_v51 = vpop.f32.mrf.mxu1 }
 0x19a   :  { %v272_v53 = vpop.f32.mrf.mxu2  ;;  %v292_v55 = vpop.f32.mrf.mxu3 }
 0x19b   :  { %v273_v54 = vadd.f32 %v443_v52, %v272_v53 }
 0x19d   :  { %v293_v56 = vadd.f32 %v292_v55, %v273_v54 }
 0x19f   :  { %296 = vrot.lane.b32.xlu2 %v293_v56, %s508_s11 }
 0x1f9   :  { %v297_v57 = vpop.permute.xlu2 %296 }
 0x1fa   :  { %v299_v58 = vsub.f32 %v293_v56, %v297_v57 }
 0x1fc   :  { %v300_v59 = vand.u32 2147483647, %v299_v58  ;;  %vm320_vm4 = vcmp.ge.f32.partialorder %v299_v58, 0.0 }
 0x1fe   :  { %v301_v60 = vsub.f32 0.0, %v300_v59 }
 0x200   :  { %v302_v61 = vmul.f32 1.442695, %v301_v60 }
 0x202   :  { %444 = vpow2.f32 %v302_v61 }
 0x208   :  { %v445_v62 = vpop.eup %444 }
 0x209   :  { %v304_v63 = vadd.f32 1.0, %v445_v62 }
 0x20b   :  { %446 = vrcp.f32 %v304_v63  ;;  %v316_v3 = vand.u32 2147483648, %v304_v63  ;;  %v314_v5 = vand.u32 2147483647, %v304_v63  ;;  %vm310_vm1 = vweird.f32 %v304_v63 }
 0x20d   :  { %v317_v7 = vor.u32 1.1754944e-38, %v316_v3  ;;  %vm315_vm3 = vcmp.eq.f32.partialorder %v314_v5, 8.507059e+37 }
 0x211   :  { %v447_v0 = vpop.eup %446 }
 0x212   :  { %v306_v1 = vmul.f32 %v447_v0, %v304_v63  ;;  %vm311_vm0 = vweird.f32 %v447_v0 }
 0x213   :  { %vm312_vm2 = vmor %vm310_vm1, %vm311_vm0 }
 0x214   :  { %v307_v2 = vsub.f32 1.0, %v306_v1 }
 0x216   :  { %v308_v4 = vmul.f32 %v447_v0, %v307_v2 }
 0x218   :  { %v309_v6 = vadd.f32 %v447_v0, %v308_v4 }
 0x21a   :  { %v313_v8 = vsel %vm312_vm2, %v447_v0, %v309_v6 }
 0x21b   :  { %v318_v9 = vsel %vm315_vm3, %v317_v7, %v313_v8 }
 0x21c   :  { %v321_v10 = vsub.f32 1.0, %v318_v9 }
 0x21e   :  { %v322_v11 = vsel %vm320_vm4, %v318_v9, %v321_v10 }
 0x21f   :  { %329 = vperm.xlu2 %439, %v322_v11   ;;  %v326_v12 = vsub.f32 1.0, %v322_v11 }
 0x221   :  { %334 = vperm.xlu1 %440, %v326_v12  }
 0x279   :  { %v330_v15 = vpop.permute.xlu2 %329 }
 0x293   :  { %v335_v16 = vpop.permute.xlu1 %334 }
 0x294   :  { %v337_v17 = vsel %vm325_vm5, %v330_v15, %v335_v16 }
 0x295   :  { %339 = vst.msk [vmem:[%s568_s5] sm:$0xff] %vm338_vm6, %v337_v17 }
 0x296   :  { %344 = vsyncpa [#allocation3], 1 }
 0x297   :  { %345 = vsyncpa [#allocation5], 1 }

</bundles_post_ra>
